<compile_context>
chip_gen: v7x
topology: tpu7x:2x2x1
jax: 0.10.0
libtpu: 0.0.40
codegen_flags: <defaults>
</compile_context>

<pallas_src>
import jax
import jax.numpy as jnp
from jax.experimental import pallas as pl
from jax.experimental.pallas import tpu as pltpu

BN_EPS = 1e-5  # model_config.HEAD.BATCHNORM_EPS (synthetic)


def head_kernel(x_ref, w_ref, b_ref, o_ref):
    """One row tile of the fused head: o = x @ W_eff_packed + b_eff_packed."""
    x = x_ref[...].astype(jnp.bfloat16)  # in-VMEM cast; no-op if x is already bf16
    o = jnp.dot(x, w_ref[...], preferred_element_type=jnp.float32) + b_ref[...]
    o_ref[...] = o.astype(o_ref.dtype)


def _round_up(n, m):
    return ((n + m - 1) // m) * m


def linear_eval_pooled_mlp(x, params, *, use_bn=False, use_relu=False,
                           row_tile=None, out_dtype=None):
    """x: (B, S, E). Returns (S, B, dims[-1]) matching the PyTorch head.

    row_tile: packed rows per grid step (None -> derived so each x block ~2 MiB).
    out_dtype: output dtype (None -> x.dtype; pass bf16 on v5e to halve writeback).
    """
    if use_bn or use_relu:
        # TODO(synk): nonlinear MLP variant (use_bn/use_relu=True) needs the
        # two-matmul kernel; the single-matmul fold below is only valid for the
        # default affine stack.
        raise NotImplementedError("fused kernel assumes use_bn=False, use_relu=False")

    B, S, E = x.shape
    gamma, beta, mean, var, w1, b1, w2, b2 = params
    F = w2.shape[1]
    if out_dtype is None:
        out_dtype = x.dtype

    # ---- Fold BN(E) + Linear(E,H) + Linear(H,F) into one affine map (f32) ----
    scale = gamma * jax.lax.rsqrt(var + BN_EPS)        # (1, E)
    shift = beta - mean * scale                        # (1, E)
    w1f = w1 * scale.reshape(E, 1)                     # (E, H)
    b1f = b1 + shift @ w1                              # (1, H)
    w_eff = w1f @ w2                                   # (E, F)
    b_eff = b1f @ w2 + b2                              # (1, F)

    # ---- Lane packing: make K/N 128-lane dense via a block-diagonal weight ----
    pack = 128 // F if (F < 128 and 128 % F == 0) else 1
    Kp, Np = pack * E, pack * F
    if pack > 1:
        w_pack = jnp.kron(jnp.eye(pack, dtype=w_eff.dtype), w_eff)   # (Kp, Np)
        b_pack = jnp.tile(b_eff, (1, pack))                          # (1, Np)
    else:
        w_pack, b_pack = w_eff, b_eff
    w_pack = w_pack.astype(jnp.bfloat16)

    # ---- Flatten (B, S) -> M rows, group `pack` rows per packed row ----
    M = B * S
    xm = x.reshape(M, E)                               # free metadata reshape
    mp = pl.cdiv(M, pack)                              # packed rows
    x_itemsize = xm.dtype.itemsize

    if row_tile is None:                               # ~2 MiB x block per step
        row_tile = max(8, ((2 << 20) // (Kp * x_itemsize)) // 8 * 8)

    if mp <= 8:
        tile = mp                                      # block dim == full array dim
    else:
        tile = min(row_tile, _round_up(mp, 8))
        if _round_up(mp, tile) == tile:                # would be a single grid step:
            tile = _round_up(pl.cdiv(mp, 2), 8)        # split so v7x's 2nd TC gets work
        tile = _round_up(tile, 8)

    mp_pad = _round_up(mp, tile)
    M_pad = mp_pad * pack
    if M_pad != M:                                     # pad only the sub-tile remainder
        xm = jnp.pad(xm, ((0, M_pad - M), (0, 0)))
    xk = xm.reshape(mp_pad, Kp)                        # free metadata reshape

    grid = (mp_pad // tile,)
    const = lambda i: (0, 0)

    out_itemsize = jnp.dtype(out_dtype).itemsize
    flops = 2 * mp_pad * Kp * Np
    bytes_accessed = int(xk.size * x_itemsize + w_pack.size * 2 +
                         b_pack.size * 4 + mp_pad * Np * out_itemsize)

    x_block = tile * Kp * x_itemsize
    o_block = tile * Np * out_itemsize
    vmem_need = 2 * (x_block + o_block) + 2 * (w_pack.size * 2 + Np * 4)
    vmem_limit = int(min(max(2 * vmem_need, 16 << 20), 48 << 20))  # safe on v7x's 64 MiB

    out = pl.pallas_call(
        head_kernel,
        out_shape=jax.ShapeDtypeStruct((mp_pad, Np), out_dtype),
        grid=grid,
        in_specs=[
            pl.BlockSpec((tile, Kp), lambda i: (i, 0)),   # packed x rows
            pl.BlockSpec((Kp, Np), const),                # block-diag W_eff (bf16)
            pl.BlockSpec((1, Np), const),                 # tiled b_eff (f32)
        ],
        out_specs=pl.BlockSpec((tile, Np), lambda i: (i, 0)),
        compiler_params=pltpu.CompilerParams(
            dimension_semantics=("parallel",),            # shards M tiles on v7x's 2 TCs
            vmem_limit_bytes=vmem_limit),
        cost_estimate=pl.CostEstimate(
            flops=flops, transcendentals=0, bytes_accessed=bytes_accessed),
    )(xk, w_pack, b_pack)

    out = out.reshape(M_pad, F)[:M].reshape(B, S, F)
    # PyTorch permutes to (S, B, E) *before* the Linear stack; since nn.Linear
    # acts only on the last dim, permuting the (small) result is equivalent.
    return jnp.transpose(out, (1, 0, 2))                  # (S, B, F)


def init_params(key, in_channels, dims):
    """Deterministic synthetic parameters.

    BatchNorm2d(in_channels): gamma, beta, running_mean, running_var.
    MLP(dims=[E, H, F]):      Linear(E, H), Linear(H, F) weights stored as (in, out).
    """
    E = in_channels
    H, F = dims[1], dims[2]
    ks = jax.random.split(key, 8)
    gamma = 1.0 + 0.1 * jax.random.normal(ks[0], (1, E), jnp.float32)
    beta = 0.1 * jax.random.normal(ks[1], (1, E), jnp.float32)
    mean = 0.1 * jax.random.normal(ks[2], (1, E), jnp.float32)
    var = jax.random.uniform(ks[3], (1, E), jnp.float32, minval=0.5, maxval=1.5)
    w1 = jax.random.normal(ks[4], (E, H), jnp.float32) / jnp.sqrt(E)
    b1 = 0.01 * jax.random.normal(ks[5], (1, H), jnp.float32)
    w2 = jax.random.normal(ks[6], (H, F), jnp.float32) / jnp.sqrt(H)
    b2 = 0.01 * jax.random.normal(ks[7], (1, F), jnp.float32)
    return gamma, beta, mean, var, w1, b1, w2, b2


def reference(x, params):
    gamma, beta, mean, var, w1, b1, w2, b2 = params
    xn = (x - mean) * (gamma / jnp.sqrt(var + BN_EPS)) + beta      # (B, S, E)
    h = xn @ w1 + b1
    o = h @ w2 + b2
    return jnp.transpose(o, (1, 0, 2))                             # (S, B, F)


if __name__ == "__main__":
    E = 32
    dims = [E, 64, 16]            # Linear(32 -> 64), Linear(64 -> 16)
    key = jax.random.PRNGKey(0)
    kx, kp = jax.random.split(key)
    params = init_params(kp, E, dims)

    # Small case (single tile): B=2, S=16 -> M=32 -> 4 packed rows.
    x = jax.random.normal(kx, (2, 16, E), jnp.float32)
    ref = reference(x, params)
    out = jax.block_until_ready(linear_eval_pooled_mlp(x, params))
    assert out.shape == (16, 2, dims[-1]), out.shape
    # bf16 MXU path with f32 accumulation vs f32 reference -> loose-ish tol.
    assert jnp.allclose(out, ref, atol=2e-2, rtol=2e-2), float(
        jnp.max(jnp.abs(out - ref)))

    # Larger case exercising multi-tile grid + remainder padding:
    # M=200 -> 25 packed rows -> tile=16 -> grid of 2 steps (2-TC split path).
    x2 = jax.random.normal(jax.random.PRNGKey(1), (4, 50, E), jnp.float32)
    ref2 = reference(x2, params)
    out2 = jax.block_until_ready(linear_eval_pooled_mlp(x2, params))
    assert out2.shape == (50, 4, dims[-1]), out2.shape
    assert jnp.allclose(out2, ref2, atol=2e-2, rtol=2e-2), float(
        jnp.max(jnp.abs(out2 - ref2)))

    print("KERNEL_OK")
</pallas_src>

<mosaic_0001>
module attributes {stable_mosaic.version = 11 : i64} {
  func.func @head_kernel(%arg0: i32, %arg1: memref<4x256xf32, #tpu.memory_space<vmem>>, %arg2: memref<256x128xbf16, #tpu.memory_space<vmem>>, %arg3: memref<1x128xf32, #tpu.memory_space<vmem>>, %arg4: memref<4x128xf32, #tpu.memory_space<vmem>>) attributes {dimension_semantics = [#tpu.dimension_semantics<parallel>], iteration_bounds = array<i64: 1>, scalar_prefetch = 0 : i64, scratch_operands = 0 : i64, tpu.core_type = #tpu.core_type<tc>, window_params = [{transform_indices = @transform_0, window_bounds = array<i64: 4, 256>}, {pipeline_mode = #tpu.pipeline_mode<synchronous>, transform_indices = @transform_1, window_bounds = array<i64: 256, 128>}, {pipeline_mode = #tpu.pipeline_mode<synchronous>, transform_indices = @transform_2, window_bounds = array<i64: 1, 128>}, {transform_indices = @transform_3, window_bounds = array<i64: 4, 128>}]} {
    %c0 = arith.constant 0 : index
    %c0_0 = arith.constant 0 : index
    %0 = vector.load %arg1[%c0, %c0_0] : memref<4x256xf32, #tpu.memory_space<vmem>>, vector<4x256xf32>
    %1 = arith.truncf %0 : vector<4x256xf32> to vector<4x256xbf16>
    %c0_1 = arith.constant 0 : index
    %c0_2 = arith.constant 0 : index
    %2 = vector.load %arg2[%c0_1, %c0_2] : memref<256x128xbf16, #tpu.memory_space<vmem>>, vector<256x128xbf16>
    %cst = arith.constant dense<0.000000e+00> : vector<4x128xf32>
    %3 = tpu.matmul %1, %2, %cst {dimension_numbers = #tpu.dot_dimension_numbers<[1], [0], [0], [1], [0, 0, 1, 1], [], []>} : vector<4x256xbf16>, vector<256x128xbf16>, vector<4x128xf32> -> vector<4x128xf32>
    %c0_3 = arith.constant 0 : index
    %c0_4 = arith.constant 0 : index
    %4 = vector.load %arg3[%c0_3, %c0_4] : memref<1x128xf32, #tpu.memory_space<vmem>>, vector<1x128xf32>
    %5 = vector.broadcast %4 : vector<1x128xf32> to vector<4x128xf32>
    %6 = arith.addf %3, %5 : vector<4x128xf32>
    %c0_5 = arith.constant 0 : index
    %c0_6 = arith.constant 0 : index
    %7 = vector.load %arg4[%c0_5, %c0_6] : memref<4x128xf32, #tpu.memory_space<vmem>>, vector<4x128xf32>
    tpu.vector_store %arg4[%c0_5, %c0_6], %6 {strides = array<i32>} : memref<4x128xf32, #tpu.memory_space<vmem>>, vector<4x128xf32>,
    return
  }
  func.func @transform_0(%arg0: i32) -> (i32, i32) {
    %c0_i32 = arith.constant 0 : i32
    %c0_i32_0 = arith.constant 0 : i32
    return %arg0, %c0_i32 : i32, i32
  }
  func.func @transform_1(%arg0: i32) -> (i32, i32) {
    %c0_i32 = arith.constant 0 : i32
    %c0_i32_0 = arith.constant 0 : i32
    %c0_i32_1 = arith.constant 0 : i32
    return %c0_i32, %c0_i32_0 : i32, i32
  }
  func.func @transform_2(%arg0: i32) -> (i32, i32) {
    %c0_i32 = arith.constant 0 : i32
    %c0_i32_0 = arith.constant 0 : i32
    %c0_i32_1 = arith.constant 0 : i32
    return %c0_i32, %c0_i32_0 : i32, i32
  }
  func.func @transform_3(%arg0: i32) -> (i32, i32) {
    %c0_i32 = arith.constant 0 : i32
    %c0_i32_0 = arith.constant 0 : i32
    return %arg0, %c0_i32 : i32, i32
  }
}

</mosaic_0001>

<bundles_post_ra>
// kernel: tpu_custom_call.1
= control target key start
LH: loop header
LB: loop body
LE: loop exit
PB: predicated region body
PF: predicated region fallthrough
CT: control target
= control target key end

     0   :  { %8 = vsyncpa [#allocation3], 0  ;;  %s444_s0 = inlined_call_operand.hbm [shape: f32[4,256], index: 0, kind: input, shape index: {}]   ;;  %s445_s1 = inlined_call_operand.hbm [shape: bf16[256,128], index: 1, kind: input, shape index: {}]   ;;  %s446_s2 = inlined_call_operand.vmem [shape: f32[1,128], index: 2, kind: input, shape index: {}]   ;;  %s447_s3 = inlined_call_operand.hbm [shape: f32[4,128], index: 3, kind: output, shape index: {}]  }
   0x1   :  { %9 = vsyncpa [#allocation6], 0 }
   0x2   :  { %10 = vsyncpa [#allocation4], 0  ;;  %s373_s12 = smov [#allocation2]   ;;  %s374_s14 = smov [#allocation5]  }
   0x3   :  { %s17_s13 = sshll.u32 %s373_s12, 4  ;;  %s26_s15 = sshll.u32 %s374_s14, 4  ;;  %s18_s13 = int_to_ptr.vmem [resolvable:$true] %s17_s13  ;;  %s398_s15 = int_to_ptr.vmem [resolvable:$true] %s26_s15 }
   0x4   :  { %s301_s18 = scalar_lea.hbm %s444_s0, 128 }
   0x5   :  { %p302_p0 = scmp.ne.s32.totalorder %s444_s0, %s301_s18  ;;  %p305_p1 = scmp.lt.u32.totalorder %s301_s18, %s444_s0 }
   0x7   :  { %p307_p2 = pnand %p305_p1, %p302_p0 }
   0x9   :  { %310 = shalt.err (!%p307_p2)
}
   0xa   :  { %s311_s23 = scalar_lea.vmem %s18_s13, 128  ;;  %p316_p4 = scmp.lt.s32.totalorder %s18_s13, %s18_s13 }
   0xb   :  { %p312_p3 = scmp.ne.s32.totalorder %s18_s13, %s311_s23  ;;  %p317_p5 = scmp.lt.s32.totalorder %s311_s23, %s311_s23 }
   0xd   :  { %p318_p6 = por %p317_p5, %p316_p4 }
   0xf   :  { %p319_p7 = pnand %p318_p6, %p312_p3 }
  0x11   :  { %322 = shalt.err (!%p319_p7)
}
  0x12   :  { %20 = dma.hbm_to_vmem [thread:$0]  %s444_s0, 128, %s18_s13, [#allocation3]  }
  0x13   :  { %s323_s28 = scalar_lea.hbm %s445_s1, 2048 }
  0x14   :  { %p324_p8 = scmp.ne.s32.totalorder %s445_s1, %s323_s28  ;;  %p327_p9 = scmp.lt.u32.totalorder %s323_s28, %s445_s1 }
  0x16   :  { %p329_p10 = pnand %p327_p9, %p324_p8 }
  0x18   :  { %332 = shalt.err (!%p329_p10)
}
  0x19   :  { %s333_s6 = scalar_lea.vmem %s398_s15, 2048  ;;  %p338_p12 = scmp.lt.s32.totalorder %s398_s15, %s398_s15 }
  0x1a   :  { %p334_p11 = scmp.ne.s32.totalorder %s398_s15, %s333_s6  ;;  %p339_p13 = scmp.lt.s32.totalorder %s333_s6, %s333_s6 }
  0x1c   :  { %p340_p0 = por %p339_p13, %p338_p12 }
  0x1e   :  { %p341_p1 = pnand %p340_p0, %p334_p11 }
  0x20   :  { %344 = shalt.err (!%p341_p1)
}
  0x21   :  { %s375_s0 = smov 64   ;;  %s376_s7 = smov 4  }
  0x22   :  { %32 = dma.hbm_to_vmem [thread:$0]  %s445_s1, 2048, %s398_s15, [#allocation6], %s375_s0, %s375_s0, %s376_s7  }
  0x23   :  { %367 = dma.done.wait [#allocation3], 128  }
  0x24   :  { %368 = vsyncadd [#allocation3], 4294967168 }
  0x25   :  { %369 = dma.done.wait [#allocation6], 2048  }
  0x26   :  { %370 = vsyncadd [#allocation6], 4294965248  ;;  %v284_v0 = vld [vmem:[#allocation5 + $0x40] sm:$0xff]   ;;  %v286_v2 = vld [vmem:[#allocation5 + $0x48] sm:$0xff]   ;;  %s377_s11 = smov [#allocation7]  }
  0x27   :  { %v285_v1 = vld [vmem:[#allocation5] sm:$0xff]   ;;  %257 = vmatprep.subr.bf16.mxu0 %v284_v0  ;;  %v287_v3 = vld [vmem:[#allocation5 + $0x8] sm:$0xff]   ;;  %v288_v4 = vld [vmem:[#allocation5 + $0x50] sm:$0xff]   ;;  %s230_s12 = sshll.u32 %s377_s11, 4  ;;  %s231_s12 = int_to_ptr.vmem [resolvable:$true] %s230_s12 }
  0x28   :  { %258 = vmatpush3.bf16.msra.mxu0 %v285_v1  ;;  %v289_v5 = vld [vmem:[#allocation5 + $0x10] sm:$0xff]   ;;  %v290_v6 = vld [vmem:[#allocation5 + $0x58] sm:$0xff]   ;;  %v292_v8 = vld [vmem:[#allocation5 + $0x60] sm:$0xff]   ;;  %s345_s13 = scalar_lea.vmem %s231_s12, 64  ;;  %p350_p3 = scmp.lt.s32.totalorder %s231_s12, %s231_s12 }
  0x29   :  { %259 = vmatprep.subr.bf16.mxu0 %v286_v2  ;;  %v291_v7 = vld [vmem:[#allocation5 + $0x18] sm:$0xff]   ;;  %v293_v9 = vld [vmem:[#allocation5 + $0x20] sm:$0xff]   ;;  %v294_v10 = vld [vmem:[#allocation5 + $0x68] sm:$0xff]   ;;  %p346_p2 = scmp.ne.s32.totalorder %s231_s12, %s345_s13  ;;  %p351_p4 = scmp.lt.s32.totalorder %s345_s13, %s345_s13 }
  0x2a   :  { %v42_v11 = vld [vmem:[#allocation2] sm:$0xff]  ;;  %v295_v13 = vld [vmem:[#allocation5 + $0x28] sm:$0xff]   ;;  %v296_v15 = vld [vmem:[#allocation5 + $0x70] sm:$0xff]  }
  0x2b   :  { %v44_v12 = vcombine.high %v42_v11, %v42_v11  ;;  %v297_v16 = vld [vmem:[#allocation5 + $0x30] sm:$0xff]   ;;  %v298_v17 = vld [vmem:[#allocation5 + $0x78] sm:$0xff]   ;;  %v46_v19 = vpack.c.bf16 %v42_v11, %v42_v11  ;;  %p352_p5 = por %p351_p4, %p350_p3 }
  0x2c   :  { %260 = vmatpush3.bf16.msra.mxu0 %v287_v3  ;;  %v299_v18 = vld [vmem:[#allocation5 + $0x38] sm:$0xff]  }
  0x2d   :  { %261 = vmatprep.subr.bf16.mxu0 %v288_v4  ;;  %v47_v14 = vpack.c.bf16 %v44_v12, %v44_v12  ;;  %v240_v21 = vld [vmem:[%s446_s2] ss:$0 sm:$0xff]  ;;  %p353_p6 = pnand %p352_p5, %p346_p2 }
  0x2f   :  { %215 = vmatprep.mubr.bf16.mxu0 %v47_v14 }
  0x30   :  { %262 = vmatpush3.bf16.msra.mxu0 %v289_v5 }
  0x31   :  { %263 = vmatprep.subr.bf16.mxu0 %v290_v6 }
  0x34   :  { %264 = vmatpush3.bf16.msra.mxu0 %v291_v7 }
  0x35   :  { %265 = vmatprep.subr.bf16.mxu0 %v292_v8 }
  0x38   :  { %266 = vmatpush3.bf16.msra.mxu0 %v293_v9 }
  0x39   :  { %267 = vmatprep.subr.bf16.mxu0 %v294_v10 }
  0x3c   :  { %268 = vmatpush3.bf16.msra.mxu0 %v295_v13 }
  0x3d   :  { %269 = vmatprep.subr.bf16.mxu0 %v296_v15 }
  0x40   :  { %270 = vmatpush3.bf16.msra.mxu0 %v297_v16 }
  0x41   :  { %271 = vmatprep.subr.bf16.mxu0 %v298_v17 }
  0x44   :  { %272 = vmatpush3.bf16.msra.mxu0 %v299_v18 }
  0x47   :  { %216 = vmatmul.mubr.bf16.vlgmr.msra.gmra.mrb[0].mxu0 %v46_v19 }
 0x11a   :  { %v273_v20 = vpop.f32.mrb[0].mxu0 }
 0x11b   :  { %v274_v22 = vpop.f32.mrb[1].mxu0 }
 0x11c   :  { %v275_v23 = vadd.f32 %v274_v22, %v273_v20  ;;  %v276_v24 = vpop.f32.mrb[2].mxu0 }
 0x11d   :  { %v277_v25 = vpop.f32.mrb[3].mxu0 }
 0x11e   :  { %v218_v26 = vadd.f32 %v275_v23, %v240_v21 }
 0x120   :  { %223 = vst [vmem:[#allocation7] sm:$0xf] %v218_v26 }
 0x121   :  { %356 = shalt.err (!%p353_p6)
}
 0x122   :  { %s357_s2 = scalar_lea.hbm %s447_s3, 64 }
 0x123   :  { %p358_p7 = scmp.ne.s32.totalorder %s447_s3, %s357_s2  ;;  %p361_p8 = scmp.lt.u32.totalorder %s357_s2, %s447_s3 }
 0x125   :  { %p363_p9 = pnand %p361_p8, %p358_p7 }
 0x127   :  { %366 = shalt.err (!%p363_p9)
}
 0x128   :  { %233 = dma.vmem_to_hbm [thread:$0]  %s231_s12, 64, %s447_s3, [#allocation4]  }
 0x129   :  { %371 = dma.done.wait [#allocation4], 64  }
 0x12a   :  { %372 = vsyncadd [#allocation4], 4294967232 }
 0x12b   :  { %237 = vsyncpa [#allocation3], 1 }
 0x12c   :  { %238 = vsyncpa [#allocation6], 1 }
 0x12d   :  { %239 = vsyncpa [#allocation4], 1 }

</bundles_post_ra>
